<compile_context>
chip_gen: v7x
topology: tpu7x:2x2x1
jax: 0.10.0
libtpu: 0.0.40
codegen_flags: <defaults>
</compile_context>

<pallas_src>
import functools

import jax
import jax.numpy as jnp
from jax.experimental import pallas as pl
from jax.experimental.pallas import tpu as pltpu


_MAX_BLOCK_ELEMS = 256 * 1024  # cap on N*tile elements per block (~1 MiB for f32)


def _mbstd_tiled_kernel(x_ref, o_ref, acc_ref, *, n_x_tiles, feat_count):
    """x_ref/o_ref: (N, tile) blocks of the flattened input/output. acc_ref: SMEM (1,) f32."""
    i = pl.program_id(0)

    @pl.when(i == 0)
    def _init():
        acc_ref[0] = jnp.float32(0.0)

    # Steps [0, n_x_tiles): copy the x tile through and accumulate sum(sqrt(var + eps)).
    @pl.when(i < n_x_tiles)
    def _copy_and_accumulate():
        x_src = x_ref[...]                                   # single load, reused below
        x = x_src.astype(jnp.float32)                        # (N, tile)
        inv_n = jnp.float32(1.0 / x.shape[0])
        mean = jnp.sum(x, axis=0, keepdims=True) * inv_n     # (1, tile)
        d = x - mean
        var = jnp.sum(d * d, axis=0, keepdims=True) * inv_n  # two-pass (centered) variance
        std = jnp.sqrt(var + jnp.float32(1e-8))
        acc_ref[0] += jnp.sum(std)
        o_ref[...] = x_src                                   # lane-dense copy, src dtype

    # Steps [n_x_tiles, n_tiles): all stats done -> broadcast the scalar std channel.
    @pl.when(i >= n_x_tiles)
    def _write_std_channel():
        std_scalar = acc_ref[0] * jnp.float32(1.0 / feat_count)
        o_ref[...] = jnp.full(o_ref.shape, std_scalar).astype(o_ref.dtype)


def _mbstd_whole_kernel(x_ref, o_ref, *, feat_count):
    """Fallback for C*H*W % 128 != 0: whole-array full-dim blocks, single grid step."""
    x_src = x_ref[...]                                       # (N, C, H, W)
    x = x_src.astype(jnp.float32)
    inv_n = jnp.float32(1.0 / x.shape[0])
    mean = jnp.sum(x, axis=0, keepdims=True) * inv_n
    d = x - mean
    var = jnp.sum(d * d, axis=0, keepdims=True) * inv_n      # (1, C, H, W)
    std = jnp.sqrt(var + jnp.float32(1e-8))
    std_scalar = jnp.sum(std) * jnp.float32(1.0 / feat_count)
    c = x_src.shape[1]
    o_ref[:, :c] = x_src
    o_ref[:, c:] = jnp.full((x_src.shape[0], 1) + x_src.shape[2:],
                            std_scalar).astype(o_ref.dtype)


def _pick_tile(f, max_tile_elems):
    """Largest multiple-of-128 divisor of f, capped at max_tile_elems (>= 128)."""
    cap = max(128, min(f, max_tile_elems))
    best = 128
    t = 128
    while t <= cap:
        if f % t == 0:
            best = t
        t += 128
    return best


def minibatch_std(x):
    n, c, h, w = x.shape
    hw = h * w
    f = c * hw                 # flattened input feature size
    f_out = f + hw             # flattened output feature size (extra std channel)
    itemsize = jnp.dtype(x.dtype).itemsize

    if f % 128 != 0:
        # Tiny / irregular feature maps (e.g. 4x4 heads with few channels): one step,
        # full-dim 4-D blocks (always legal), whole array easily fits VMEM.
        # TODO(synk): huge non-multiple-of-128 feature maps would need tiling too.
        return pl.pallas_call(
            functools.partial(_mbstd_whole_kernel, feat_count=f),
            out_shape=jax.ShapeDtypeStruct((n, c + 1, h, w), x.dtype),
            grid=(1,),
            in_specs=[pl.BlockSpec((n, c, h, w), lambda i: (0, 0, 0, 0))],
            out_specs=pl.BlockSpec((n, c + 1, h, w), lambda i: (0, 0, 0, 0)),
        )(x)

    tile = _pick_tile(f, _MAX_BLOCK_ELEMS // n)
    n_x_tiles = f // tile                 # steps carrying data + stats
    n_std_tiles = pl.cdiv(hw, tile)       # trailing steps writing the std channel (usually 1)
    n_tiles = n_x_tiles + n_std_tiles

    x2 = x.reshape(n, f)                  # lane-dense view, bit-identical to NCHW layout

    kernel = functools.partial(
        _mbstd_tiled_kernel, n_x_tiles=n_x_tiles, feat_count=f)

    # TODO(synk): on v7x, split the feature range across both TensorCores (core_map +
    # per-core partial sums combined via core_barrier) for up to ~2x on this mem-bound copy.
    out2 = pl.pallas_call(
        kernel,
        out_shape=jax.ShapeDtypeStruct((n, f_out), x.dtype),
        grid=(n_tiles,),
        in_specs=[
            # Clamp so the trailing std steps revisit the last x block (no extra DMA).
            pl.BlockSpec((n, tile), lambda i: (0, jnp.minimum(i, n_x_tiles - 1))),
        ],
        out_specs=pl.BlockSpec((n, tile), lambda i: (0, i)),
        scratch_shapes=[pltpu.SMEM((1,), jnp.float32)],
        compiler_params=pltpu.CompilerParams(
            # The scalar accumulator + finalize carry across steps -> sequential grid.
            dimension_semantics=("arbitrary",),
            vmem_limit_bytes=32 * 1024 * 1024,
        ),
        cost_estimate=pl.CostEstimate(
            flops=4 * n * f,
            transcendentals=f,
            bytes_accessed=(n * f + n * f_out) * itemsize,
        ),
    )(x2)

    return out2.reshape(n, c + 1, h, w)


def _reference(x):
    x32 = x.astype(jnp.float32)
    centered = x32 - jnp.mean(x32, axis=0, keepdims=True)
    var = jnp.mean(jnp.square(centered), axis=0)
    std = jnp.sqrt(var + 1e-8)
    std = jnp.mean(std).astype(x.dtype)
    std_map = jnp.full((x.shape[0], 1, x.shape[2], x.shape[3]), std, dtype=x.dtype)
    return jnp.concatenate([x, std_map], axis=1)


if __name__ == "__main__":
    key = jax.random.PRNGKey(0)

    # Main tiled path: f = C*H*W = 1024 (multiple of 128). This also exercises the
    # masked partial final output block that carries the appended std channel.
    x = jax.random.normal(key, (2, 4, 16, 16), dtype=jnp.float32)  # (N, C, H, W)
    out = jax.block_until_ready(minibatch_std(x))
    ref = jax.block_until_ready(_reference(x))
    assert out.shape == (2, 5, 16, 16), out.shape
    assert out.dtype == x.dtype
    assert jnp.allclose(out, ref, atol=1e-5, rtol=1e-5), "mismatch vs reference (tiled path)"

    # Fallback path: f = 3*4*4 = 48 (not a multiple of 128) -> whole-array 4-D kernel.
    x_small = jax.random.normal(jax.random.PRNGKey(0), (2, 3, 4, 4), dtype=jnp.float32)
    out_small = jax.block_until_ready(minibatch_std(x_small))
    ref_small = jax.block_until_ready(_reference(x_small))
    assert out_small.shape == (2, 4, 4, 4), out_small.shape
    assert jnp.allclose(out_small, ref_small, atol=1e-5, rtol=1e-5), \
        "mismatch vs reference (fallback path)"

    print("KERNEL_OK")
</pallas_src>

<mosaic_0001>
module attributes {stable_mosaic.version = 11 : i64} {
  func.func @_mbstd_tiled_kernel(%arg0: i32, %arg1: memref<2x1024xf32, #tpu.memory_space<vmem>>, %arg2: memref<2x1024xf32, #tpu.memory_space<vmem>>, %arg3: memref<1xf32, #tpu.memory_space<smem>>) attributes {dimension_semantics = [#tpu.dimension_semantics<arbitrary>], iteration_bounds = array<i64: 2>, scalar_prefetch = 0 : i64, scratch_operands = 1 : i64, tpu.core_type = #tpu.core_type<tc>, window_params = [{transform_indices = @transform_0, window_bounds = array<i64: 2, 1024>}, {transform_indices = @transform_1, window_bounds = array<i64: 2, 1024>}]} {
    %c0_i32 = arith.constant 0 : i32
    %0 = arith.cmpi eq, %arg0, %c0_i32 : i32
    %1 = arith.extui %0 : i1 to i32
    %c0_i32_0 = arith.constant 0 : i32
    %2 = arith.cmpi ne, %1, %c0_i32_0 : i32
    scf.if %2 {
      %cst = arith.constant 0.000000e+00 : f32
      %c0 = arith.constant 0 : index
      %9 = memref.load %arg3[%c0] : memref<1xf32, #tpu.memory_space<smem>>
      memref.store %cst, %arg3[%c0] : memref<1xf32, #tpu.memory_space<smem>>
    } else {
    }
    %c1_i32 = arith.constant 1 : i32
    %3 = arith.cmpi slt, %arg0, %c1_i32 : i32
    %4 = arith.extui %3 : i1 to i32
    %c0_i32_1 = arith.constant 0 : i32
    %5 = arith.cmpi ne, %4, %c0_i32_1 : i32
    scf.if %5 {
      %c0 = arith.constant 0 : index
      %c0_4 = arith.constant 0 : index
      %9 = vector.load %arg1[%c0, %c0_4] : memref<2x1024xf32, #tpu.memory_space<vmem>>, vector<2x1024xf32>
      %cst = arith.constant dense<0.000000e+00> : vector<1024xf32>
      %10 = vector.multi_reduction <add>, %9, %cst [0] : vector<2x1024xf32> to vector<1024xf32>
      %11 = vector.shape_cast %10 : vector<1024xf32> to vector<1x1024xf32>
      %cst_5 = arith.constant 5.000000e-01 : f32
      %12 = vector.broadcast %cst_5 : f32 to vector<1x1024xf32>
      %13 = arith.mulf %11, %12 : vector<1x1024xf32>
      %14 = vector.broadcast %13 : vector<1x1024xf32> to vector<2x1024xf32>
      %15 = arith.subf %9, %14 : vector<2x1024xf32>
      %16 = arith.mulf %15, %15 : vector<2x1024xf32>
      %cst_6 = arith.constant dense<0.000000e+00> : vector<1024xf32>
      %17 = vector.multi_reduction <add>, %16, %cst_6 [0] : vector<2x1024xf32> to vector<1024xf32>
      %18 = vector.shape_cast %17 : vector<1024xf32> to vector<1x1024xf32>
      %cst_7 = arith.constant 5.000000e-01 : f32
      %19 = vector.broadcast %cst_7 : f32 to vector<1x1024xf32>
      %20 = arith.mulf %18, %19 : vector<1x1024xf32>
      %cst_8 = arith.constant 9.99999993E-9 : f32
      %21 = vector.broadcast %cst_8 : f32 to vector<1x1024xf32>
      %22 = arith.addf %20, %21 : vector<1x1024xf32>
      %23 = math.sqrt %22 : vector<1x1024xf32>
      %c0_9 = arith.constant 0 : index
      %24 = memref.load %arg3[%c0_9] : memref<1xf32, #tpu.memory_space<smem>>
      %25 = vector.shape_cast %23 : vector<1x1024xf32> to vector<1x1x1024xf32>
      %cst_10 = arith.constant dense<0.000000e+00> : vector<1xf32>
      %26 = vector.multi_reduction <add>, %25, %cst_10 [1, 2] : vector<1x1x1024xf32> to vector<1xf32>
      %27 = vector.shape_cast %26 : vector<1xf32> to vector<1x1x1xf32>
      %28 = vector.extract %27[0, 0, 0] : f32 from vector<1x1x1xf32>
      %29 = arith.addf %24, %28 : f32
      %c0_11 = arith.constant 0 : index
      %30 = memref.load %arg3[%c0_11] : memref<1xf32, #tpu.memory_space<smem>>
      memref.store %29, %arg3[%c0_11] : memref<1xf32, #tpu.memory_space<smem>>
      %c0_12 = arith.constant 0 : index
      %c0_13 = arith.constant 0 : index
      %31 = vector.load %arg2[%c0_12, %c0_13] : memref<2x1024xf32, #tpu.memory_space<vmem>>, vector<2x1024xf32>
      tpu.vector_store %arg2[%c0_12, %c0_13], %9 {strides = array<i32>} : memref<2x1024xf32, #tpu.memory_space<vmem>>, vector<2x1024xf32>,
    } else {
    }
    %c1_i32_2 = arith.constant 1 : i32
    %6 = arith.cmpi sge, %arg0, %c1_i32_2 : i32
    %7 = arith.extui %6 : i1 to i32
    %c0_i32_3 = arith.constant 0 : i32
    %8 = arith.cmpi ne, %7, %c0_i32_3 : i32
    scf.if %8 {
      %c0 = arith.constant 0 : index
      %9 = memref.load %arg3[%c0] : memref<1xf32, #tpu.memory_space<smem>>
      %cst = arith.constant 9.765625E-4 : f32
      %10 = arith.mulf %9, %cst : f32
      %11 = vector.broadcast %10 : f32 to vector<2x1024xf32>
      %c0_4 = arith.constant 0 : index
      %c0_5 = arith.constant 0 : index
      %12 = vector.load %arg2[%c0_4, %c0_5] : memref<2x1024xf32, #tpu.memory_space<vmem>>, vector<2x1024xf32>
      tpu.vector_store %arg2[%c0_4, %c0_5], %11 {strides = array<i32>} : memref<2x1024xf32, #tpu.memory_space<vmem>>, vector<2x1024xf32>,
    } else {
    }
    return
  }
  func.func @transform_0(%arg0: i32) -> (i32, i32) {
    %c0_i32 = arith.constant 0 : i32
    %0 = arith.minsi %arg0, %c0_i32 : i32
    %c0_i32_0 = arith.constant 0 : i32
    %c0_i32_1 = arith.constant 0 : i32
    return %c0_i32_0, %0 : i32, i32
  }
  func.func @transform_1(%arg0: i32) -> (i32, i32) {
    %c0_i32 = arith.constant 0 : i32
    %c0_i32_0 = arith.constant 0 : i32
    return %c0_i32, %arg0 : i32, i32
  }
}

</mosaic_0001>

<bundles_post_ra>
// kernel: tpu_custom_call.1
= control target key start
LH: loop header
LB: loop body
LE: loop exit
PB: predicated region body
PF: predicated region fallthrough
CT: control target
= control target key end

     0   :  { %6 = vsyncpa [#allocation4], 0  ;;  %s1190_s0 = inlined_call_operand.hbm [shape: f32[2,1024], index: 0, kind: input, shape index: {}]   ;;  %s1191_s1 = inlined_call_operand.hbm [shape: f32[2,1280], index: 1, kind: output, shape index: {}]  }
   0x1   :  { %8 = vsyncpa [#allocation4 + $0x1], 0 }
   0x2   :  { %9 = vsyncpa [#allocation5], 0 }
   0x3   :  { %11 = vsyncpa [#allocation5 + $0x1], 0  ;;  %s872_s6 = smov 0   ;;  %s874_s7 = smov 0  }
   0x4   :  { %s876_s8 = smov 0   ;;  %s878_s9 = smov 0  }
   0x5   :  { %s880_s10 = smov 0   ;;  %s882_s11 = smov 0  }
   0x6   :  { %s884_s12 = smov 0  }
   0x7 LB: > { %s906_s13 = sadd.s32 4294967295, %s856_s12   ;;  %s619_s14 = sadd.s32 4294967294, %s856_s12   ;;  %s856_s12 = sphi %s884_s12, %s1210_s12   ;;  %s852_s11 = sphi %s882_s11, %s1209_s11   ;;  %s848_s10 = sphi %s880_s10, %s1208_s10   ;;  %s844_s9 = sphi %s878_s9, %s1207_s9   ;;  %s840_s8 = sphi %s876_s8, %s1206_s8   ;;  %s836_s7 = sphi %s874_s7, %s1205_s7   ;;  %s832_s6 = sphi %s872_s6, %s1204_s6  }
   0x8   : > { %s910_s15 = sadd.s32 1, %s856_s12   ;;  %p21_p0 = scmp.lt.s32.totalorder %s856_s12, 0 }
   0x9   : > { %p23_p1 = scmp.lt.s32.totalorder %s910_s15, 0  ;;  %s28_s16 = sadd.s32 1, %s852_s11 }
   0xa   : > { %s22_s17 = scalar_select %p21_p0, %s856_s12, 0 }
   0xb   : > { %s24_s18 = scalar_select %p23_p1, %s910_s15, 0 }
   0xc   : > { %p35_p2 = scmp.ne.s32.totalorder %s852_s11, %s848_s10  ;;  %p36_p3 = scmp.eq.s32.totalorder %s856_s12, 0 }
   0xd   : > { %s25_s19 = ssub.s32 %s22_s17, %s24_s18  ;;  %p41_p4 = scmp.ne.s32.totalorder %s848_s10, %s844_s9 }
   0xe   : > { %p26_p5 = scmp.eq.s32.totalorder %s25_s19, 0  ;;  %p921_p6 = por %p36_p3, %p35_p2 }
   0xf   : > { %p1192_p7 = scmp.eq.s32.totalorder %s906_s13, 0  ;;  %s51_s21 = ssub.s32 %s856_s12, %s910_s15 }
  0x10   : > { %s929_s22 = scalar_select %p26_p5, %s852_s11, %s28_s16  }
  0x11   : > { %p933_p8 = por %p1192_p7, %p41_p4  ;;  %p52_p9 = scmp.eq.s32.totalorder %s51_s21, 0 }
  0x12   : > { %s54_s24 = sadd.s32 1, %s840_s8  ;;  %p64_p10 = scmp.ne.s32.totalorder %s840_s8, %s836_s7 }
  0x13   : > { %s941_s25 = scalar_select %p52_p9, %s840_s8, %s54_s24  }
  0x14   : > { %p65_p11 = scmp.eq.s32.totalorder %s906_s13, 1  ;;  %p70_p12 = scmp.ne.s32.totalorder %s836_s7, %s832_s6 }
  0x15   : > { %p71_p13 = scmp.eq.s32.totalorder %s619_s14, 1  ;;  %p657_p2 = scmp.lt.s32.totalorder %s856_s12, 2 }
  0x16   : > { %p947_p1 = por %p65_p11, %p64_p10  ;;  %s91_s28 = sand.u32 1, %s852_s11  }
  0x17   : > { %p952_p3 = por %p71_p13, %p70_p12  ;;  %s622_s29 = sshll.u32 %s91_s28, 4 }
  0x18   : > { %s1195_s26 = scalar_select %p947_p1, 1, 0 }
  0x19   : > { %s1196_s27 = scalar_select %p952_p3, 1, 0 }
  0x1a   : > { %s640_s30 = sshll.u32 %s22_s17, 8  ;;  %s95_s5 = scalar_lea.vmem [#allocation3], %s622_s29 }
  0x1b   : > { %s960_s4 = scalar_lea.hbm %s1190_s0, %s640_s30  ;;  %s105_s9 = sshll.u32 %s95_s5, 4  ;;  %s962_s9 = int_to_ptr.vmem [resolvable:$true] %s105_s9 }
  0x1c   : > { %p966_p4 = pnand %p657_p2, %p921_p6  ;;  %s92_s16 = scalar_lea.sflag [#allocation4], %s91_s28 }
  0x1d   : > { %s736_s17 = scalar_lea.hbm %s960_s4, 256  ;;  %s741_s20 = scalar_lea.hbm %s1190_s0, 256 }
  0x1e   : > { %p737_p10 = scmp.ne.s32.totalorder %s960_s4, %s736_s17  ;;  %p738_p11 = pneg %p966_p4 }
  0x1f   : > { %p742_p6 = scmp.lt.u32.totalorder %s960_s4, %s1190_s0  ;;  %p743_p2 = scmp.lt.u32.totalorder %s741_s20, %s736_s17 }
  0x20   : > { %p739_p12 = pnand %p738_p11, %p737_p10  ;;  %p745_p7 = scmp.lt.u32.totalorder %s736_s17, %s960_s4 }
  0x21   : > { %p744_p0 = por %p743_p2, %p742_p6 }
  0x22   : > { %p740_p13 = pneg %p739_p12 }
  0x23   : > { %p746_p5 = por %p745_p7, %p744_p0 }
  0x25   : > { %p747_p9 = pnand %p746_p5, %p740_p13 }
  0x27   : > { %750 = shalt.err (!%p747_p9)
}
  0x28   : > { %s751_s28 = scalar_lea.vmem %s962_s9, 256  ;;  %s858_s29 = smov [#allocation3]  }
  0x29   : > { %p752_p10 = scmp.ne.s32.totalorder %s962_s9, %s751_s28  ;;  %s756_s30 = sshll.u32 %s858_s29, 4  ;;  %s757_s30 = int_to_ptr.vmem [resolvable:$false] %s756_s30 }
  0x2a   : > { %s758_s2 = scalar_lea.vmem %s757_s30, 512  ;;  %p759_p1 = scmp.lt.s32.totalorder %s962_s9, %s757_s30 }
  0x2b   : > { %p754_p12 = pnand %p752_p10, %p738_p11  ;;  %p760_p6 = scmp.lt.s32.totalorder %s758_s2, %s751_s28 }
  0x2d   : > { %p755_p3 = pneg %p754_p12  ;;  %p761_p2 = por %p760_p6, %p759_p1 }
  0x2f   : > { %p762_p7 = pnand %p761_p2, %p755_p3 }
  0x31   : > { %765 = shalt.err (!%p762_p7)
}
  0x32   : > { %652 = dma.hbm_to_vmem [thread:$0]  (!%p966_p4), %s960_s4, 256, %s962_s9, %s92_s16  }
  0x33   : > { %p1198_p0 = scmp.lt.s32.totalorder %s856_s12, 3  ;;  %p1199_p5 = scmp.ge.s32.totalorder %s856_s12, 1 }
  0x35   : > { %p111_p9 = pnand %p1199_p5, %p1198_p0 }
  0x36   : > { %s116_s3 = sand.u32 (!%p111_p9), 1, %s848_s10  }
  0x37   : > { %114 = sbr.rel (%p111_p9) target bundleno = 407 (0x197), region = 24  ;;  %s626_s5 = sshll.u32 (!%p111_p9), %s116_s3, 4 }
  0x38   : > { %s117_s17 = scalar_lea.sflag (!%p111_p9), [#allocation4], %s116_s3  ;;  %s120_s18 = scalar_lea.vmem (!%p111_p9), [#allocation3], %s626_s5 }
  0x3e   : > { %823 = dma.done.wait (%p933_p8), %s117_s17, 256  }
  0x3f   : > { %825 = vsyncadd (%p933_p8), %s117_s17, 4294967040  ;;  %s136_s14 = sand.u32 1, %s836_s7   ;;  %s859_s4 = smov 0.0  }
  0x40   : > { %p1200_p1 = scmp.eq.s32.totalorder %s906_s13, 0  ;;  %s627_s9 = sshll.u32 %s136_s14, 4 }
  0x41   : > { %s1011_s16 = scalar_lea.vmem [#allocation6], %s627_s9  ;;  %p629_p3 = scmp.ge.s32.totalorder %s906_s13, 1 }
  0x42   : > { %647 = sst [smem:[#allocation2]] (%p1200_p1), %s859_s4  ;;  %v1014_v0 = vld [vmem:[%s120_s18] sm:$0xff] (!%p629_p3)  ;;  %v1016_v1 = vld [vmem:[%s120_s18 + $0x8] sm:$0xff] (!%p629_p3)  ;;  %v165_v2 = vlaneseq (!%p629_p3)  ;;  %v860_v3 = vmov (!%p629_p3), 1983009808   ;;  %vm203_vm0 = vcmask (!%p629_p3), 1041408  }
  0x43   : > { %156 = sbr.rel (%p629_p3) target bundleno = 360 (0x168), region = 36  ;;  %v163_v4 = vunpack.c.l.s4 (!%p629_p3), %v860_v3  ;;  %517 = vst [vmem:[%s1011_s16] sm:$0xff] (!%p629_p3), %v1014_v0  ;;  %518 = vst [vmem:[%s1011_s16 + $0x8] sm:$0xff] (!%p629_p3), %v1016_v1  ;;  %v161_v6 = vcombine.high (!%p629_p3), %v1014_v0, %v1014_v0  ;;  %v178_v8 = vcombine.high (!%p629_p3), %v1016_v1, %v1016_v1  ;;  %vm489_vm3 = vcmask (!%p629_p3), 1040384   ;;  %s488_s23 = sld [smem:[#allocation2]] (!%p629_p3) }
  0x44   : > { %v166_v5 = vshrl.u32 (!%p629_p3), %v165_v2, 7 }
  0x45   : > { %v164_v7 = vunpack.c.0.s8 (!%p629_p3), %v163_v4 }
  0x47   : > { %v1026_v9 = vsub.s32 (!%p629_p3), %v164_v7, %v166_v5 }
  0x49   : > { %v168_v10 = vrot.slane (!%p629_p3), %v1014_v0, %v1026_v9  ;;  %v175_v11 = vrot.slane (!%p629_p3), %v161_v6, %v1026_v9  ;;  %v185_v12 = vrot.slane (!%p629_p3), %v1016_v1, %v1026_v9  ;;  %v192_v13 = vrot.slane (!%p629_p3), %v178_v8, %v1026_v9 }
  0x4b   : > { %v176_v14 = vcombine.high %v168_v10, %v168_v10  ;;  %v177_v15 = vcombine.high %v175_v11, %v175_v11  ;;  %v193_v16 = vcombine.high %v185_v12, %v185_v12  ;;  %v194_v17 = vcombine.high %v192_v13, %v192_v13 }
  0x4c   : > { %v204_v18 = vsel %vm203_vm0, %v168_v10, 0.0  ;;  %v218_v19 = vsel %vm203_vm0, %v175_v11, 0.0  ;;  %v232_v20 = vsel %vm203_vm0, %v185_v12, 0.0  ;;  %v246_v21 = vsel %vm203_vm0, %v192_v13, 0.0 }
  0x4d   : > { %v205_v22 = vrot.slane %v204_v18, 4  ;;  %v211_v23 = vsel %vm203_vm0, %v176_v14, 0.0  ;;  %v219_v24 = vrot.slane %v218_v19, 4  ;;  %v225_v25 = vsel %vm203_vm0, %v177_v15, 0.0 }
  0x4e   : > { %v212_v26 = vrot.slane %v211_v23, 4  ;;  %v226_v27 = vrot.slane %v225_v25, 4  ;;  %v233_v28 = vrot.slane %v232_v20, 4  ;;  %v239_v29 = vsel %vm203_vm0, %v193_v16, 0.0 }
  0x4f   : > { %v206_v30 = vadd.f32 %v205_v22, %v204_v18  ;;  %v220_v31 = vadd.f32 %v219_v24, %v218_v19  ;;  %v240_v32 = vrot.slane %v239_v29, 4  ;;  %v247_v33 = vrot.slane %v246_v21, 4 }
  0x50   : > { %v213_v34 = vadd.f32 %v212_v26, %v211_v23  ;;  %v227_v35 = vadd.f32 %v226_v27, %v225_v25  ;;  %v234_v36 = vadd.f32 %v233_v28, %v232_v20  ;;  %v253_v37 = vsel %vm203_vm0, %v194_v17, 0.0 }
  0x51   : > { %v207_v38 = vrot.slane %v206_v30, 2  ;;  %v221_v39 = vrot.slane %v220_v31, 2  ;;  %v241_v40 = vadd.f32 %v240_v32, %v239_v29  ;;  %v248_v41 = vadd.f32 %v247_v33, %v246_v21 }
  0x52   : > { %v214_v42 = vrot.slane %v213_v34, 2  ;;  %v228_v43 = vrot.slane %v227_v35, 2  ;;  %v235_v44 = vrot.slane %v234_v36, 2  ;;  %v254_v45 = vrot.slane %v253_v37, 4 }
  0x53   : > { %v208_v46 = vadd.f32 %v207_v38, %v206_v30  ;;  %v222_v47 = vadd.f32 %v221_v39, %v220_v31  ;;  %v242_v48 = vrot.slane %v241_v40, 2  ;;  %v249_v49 = vrot.slane %v248_v41, 2 }
  0x54   : > { %v215_v50 = vadd.f32 %v214_v42, %v213_v34  ;;  %v229_v51 = vadd.f32 %v228_v43, %v227_v35  ;;  %v236_v52 = vadd.f32 %v235_v44, %v234_v36  ;;  %v255_v53 = vadd.f32 %v254_v45, %v253_v37 }
  0x55   : > { %v209_v54 = vrot.slane %v208_v46, 1  ;;  %v223_v55 = vrot.slane %v222_v47, 1  ;;  %v243_v56 = vadd.f32 %v242_v48, %v241_v40  ;;  %v250_v57 = vadd.f32 %v249_v49, %v248_v41 }
  0x56   : > { %v216_v58 = vrot.slane %v215_v50, 1  ;;  %v230_v59 = vrot.slane %v229_v51, 1  ;;  %v237_v60 = vrot.slane %v236_v52, 1  ;;  %v256_v61 = vrot.slane %v255_v53, 2 }
  0x57   : > { %v210_v62 = vadd.f32 %v209_v54, %v208_v46  ;;  %v224_v63 = vadd.f32 %v223_v55, %v222_v47  ;;  %v244_v2 = vrot.slane %v243_v56, 1  ;;  %v251_v3 = vrot.slane %v250_v57, 1 }
  0x58   : > { %v217_v4 = vadd.f32 %v216_v58, %v215_v50  ;;  %v231_v5 = vadd.f32 %v230_v59, %v229_v51  ;;  %v238_v6 = vadd.f32 %v237_v60, %v236_v52  ;;  %v257_v7 = vadd.f32 %v256_v61, %v255_v53 }
  0x59   : > { %v245_v8 = vadd.f32 %v244_v2, %v243_v56  ;;  %v252_v10 = vadd.f32 %v251_v3, %v250_v57  ;;  %v260_v11 = vmul.f32 0.5, %v210_v62  ;;  %v262_v12 = vmul.f32 0.5, %v224_v63 }
  0x5a   : > { %v258_v13 = vrot.slane %v257_v7, 1  ;;  %v261_v14 = vmul.f32 0.5, %v217_v4  ;;  %v263_v15 = vmul.f32 0.5, %v231_v5  ;;  %v264_v16 = vmul.f32 0.5, %v238_v6 }
  0x5b   : > { %v265_v17 = vmul.f32 0.5, %v245_v8  ;;  %v266_v19 = vmul.f32 0.5, %v252_v10 }
  0x5c   : > { %v259_v18 = vadd.f32 %v258_v13, %v257_v7  ;;  %v276_v20 = vcombine.low %v260_v11, %v261_v14  ;;  %v277_v21 = vcombine.low %v262_v12, %v263_v15 }
  0x5d   : > { %v293_v22 = vcombine.low %v264_v16, %v265_v17 }
  0x5e   : > { %v267_v23 = vmul.f32 0.5, %v259_v18  ;;  %v284_v24 = vrot.slane %v276_v20, %v1026_v9  ;;  %v291_v25 = vrot.slane %v277_v21, %v1026_v9 }
  0x5f   : > { %v301_v28 = vrot.slane %v293_v22, %v1026_v9 }
  0x60   : > { %v292_v26 = vcombine.low %v284_v24, %v291_v25  ;;  %v294_v27 = vcombine.low %v266_v19, %v267_v23 }
  0x62   : > { %v308_v29 = vrot.slane %v294_v27, %v1026_v9  ;;  %v312_v30 = vsub.f32 %v1014_v0, %v292_v26 }
  0x64   : > { %v309_v31 = vcombine.low %v301_v28, %v308_v29  ;;  %v314_v32 = vmul.f32 %v312_v30, %v312_v30 }
  0x66   : > { %v313_v33 = vsub.f32 %v1016_v1, %v309_v31  ;;  %v318_v34 = vcombine.high %v314_v32, %v314_v32  ;;  %v325_v35 = vrot.slane %v314_v32, %v1026_v9 }
  0x68   : > { %v315_v36 = vmul.f32 %v313_v33, %v313_v33  ;;  %v332_v37 = vrot.slane %v318_v34, %v1026_v9  ;;  %v333_v38 = vcombine.high %v325_v35, %v325_v35  ;;  %v360_v39 = vsel %vm203_vm0, %v325_v35, 0.0 }
  0x69   : > { %v361_v40 = vrot.slane %v360_v39, 4 }
  0x6a   : > { %v334_v41 = vcombine.high %v332_v37, %v332_v37  ;;  %v335_v42 = vcombine.high %v315_v36, %v315_v36  ;;  %v342_v43 = vrot.slane %v315_v36, %v1026_v9  ;;  %v367_v0 = vsel %vm203_vm0, %v333_v38, 0.0 }
  0x6b   : > { %v362_v44 = vadd.f32 %v361_v40, %v360_v39  ;;  %v368_v45 = vrot.slane %v367_v0, 4  ;;  %v374_v1 = vsel %vm203_vm0, %v332_v37, 0.0 }
  0x6c   : > { %v349_v46 = vrot.slane %v335_v42, %v1026_v9  ;;  %v350_v47 = vcombine.high %v342_v43, %v342_v43  ;;  %v375_v48 = vrot.slane %v374_v1, 4  ;;  %v381_v49 = vsel %vm203_vm0, %v334_v41, 0.0 }
  0x6d   : > { %v363_v50 = vrot.slane %v362_v44, 2  ;;  %v369_v51 = vadd.f32 %v368_v45, %v367_v0  ;;  %v382_v52 = vrot.slane %v381_v49, 4  ;;  %v388_v53 = vsel %vm203_vm0, %v342_v43, 0.0 }
  0x6e   : > { %v351_v54 = vcombine.high %v349_v46, %v349_v46  ;;  %v376_v55 = vadd.f32 %v375_v48, %v374_v1  ;;  %v389_v56 = vrot.slane %v388_v53, 4  ;;  %v395_v57 = vsel %vm203_vm0, %v350_v47, 0.0 }
  0x6f   : > { %v364_v58 = vadd.f32 %v363_v50, %v362_v44  ;;  %v370_v59 = vrot.slane %v369_v51, 2  ;;  %v383_v60 = vadd.f32 %v382_v52, %v381_v49  ;;  %v396_v61 = vrot.slane %v395_v57, 4 }
  0x70   : > { %v377_v62 = vrot.slane %v376_v55, 2  ;;  %v390_v9 = vadd.f32 %v389_v56, %v388_v53  ;;  %v402_v63 = vsel %vm203_vm0, %v349_v46, 0.0  ;;  %v409_v2 = vsel %vm203_vm0, %v351_v54, 0.0 }
  0x71   : > { %v365_v3 = vrot.slane %v364_v58, 1  ;;  %v371_v4 = vadd.f32 %v370_v59, %v369_v51  ;;  %v384_v5 = vrot.slane %v383_v60, 2  ;;  %v397_v6 = vadd.f32 %v396_v61, %v395_v57 }
  0x72   : > { %v378_v7 = vadd.f32 %v377_v62, %v376_v55  ;;  %v391_v8 = vrot.slane %v390_v9, 2  ;;  %v403_v10 = vrot.slane %v402_v63, 4  ;;  %v410_v11 = vrot.slane %v409_v2, 4 }
  0x73   : > { %v366_v12 = vadd.f32 %v365_v3, %v364_v58  ;;  %v372_v13 = vrot.slane %v371_v4, 1  ;;  %v385_v14 = vadd.f32 %v384_v5, %v383_v60  ;;  %v398_v15 = vrot.slane %v397_v6, 2 }
  0x74   : > { %v379_v16 = vrot.slane %v378_v7, 1  ;;  %v392_v17 = vadd.f32 %v391_v8, %v390_v9  ;;  %v404_v18 = vadd.f32 %v403_v10, %v402_v63  ;;  %v411_v19 = vadd.f32 %v410_v11, %v409_v2 }
  0x75   : > { %v373_v20 = vadd.f32 %v372_v13, %v371_v4  ;;  %v386_v21 = vrot.slane %v385_v14, 1  ;;  %v399_v22 = vadd.f32 %v398_v15, %v397_v6  ;;  %v416_v23 = vmul.f32 0.5, %v366_v12 }
  0x76   : > { %v380_v24 = vadd.f32 %v379_v16, %v378_v7  ;;  %v393_v25 = vrot.slane %v392_v17, 1  ;;  %v405_v26 = vrot.slane %v404_v18, 2  ;;  %v412_v27 = vrot.slane %v411_v19, 2 }
  0x77   : > { %v387_v28 = vadd.f32 %v386_v21, %v385_v14  ;;  %v400_v29 = vrot.slane %v399_v22, 1  ;;  %v417_v30 = vmul.f32 0.5, %v373_v20  ;;  %v424_v31 = vadd.f32 1e-08, %v416_v23 }
  0x78   : > { %v394_v32 = vadd.f32 %v393_v25, %v392_v17  ;;  %v406_v33 = vadd.f32 %v405_v26, %v404_v18  ;;  %v413_v34 = vadd.f32 %v412_v27, %v411_v19  ;;  %v418_v35 = vmul.f32 0.5, %v380_v24 }
  0x79   : > { %v401_v36 = vadd.f32 %v400_v29, %v399_v22  ;;  %v419_v37 = vmul.f32 0.5, %v387_v28  ;;  %v425_v38 = vadd.f32 1e-08, %v417_v30  ;;  %720 = vrsqrt.f32 %v424_v31 }
  0x7a   : > { %v407_v39 = vrot.slane %v406_v33, 1  ;;  %v414_v40 = vrot.slane %v413_v34, 1  ;;  %v420_v41 = vmul.f32 0.5, %v394_v32  ;;  %v426_v42 = vadd.f32 1e-08, %v418_v35 }
  0x7b   : > { %v421_v43 = vmul.f32 0.5, %v401_v36  ;;  %v427_v0 = vadd.f32 1e-08, %v419_v37  ;;  %722 = vrsqrt.f32 %v425_v38  ;;  %vm434_vm1 = vcmp.eq.f32.partialorder %v424_v31, inf }
  0x7c   : > { %v408_v44 = vadd.f32 %v407_v39, %v406_v33  ;;  %v415_v45 = vadd.f32 %v414_v40, %v413_v34  ;;  %v1060_v1 = vadd.f32 1e-08, %v420_v41  ;;  %724 = vrsqrt.f32 %v426_v42 }
  0x7d   : > { %v1062_v48 = vadd.f32 1e-08, %v421_v43  ;;  %726 = vrsqrt.f32 %v427_v0  ;;  %v437_v52 = vand.u32 2147483648, %v424_v31  ;;  %vm436_vm2 = vcmp.eq.f32.partialorder %v424_v31, 0.0 }
  0x7e   : > { %v422_v46 = vmul.f32 0.5, %v408_v44  ;;  %v423_v47 = vmul.f32 0.5, %v415_v45  ;;  %728 = vrsqrt.f32 %v1060_v1  ;;  %vm441_vm4 = vcmp.eq.f32.partialorder %v425_v38, inf }
  0x7f   : > { %730 = vrsqrt.f32 %v1062_v48  ;;  %vm443_vm5 = vcmp.eq.f32.partialorder %v425_v38, 0.0  ;;  %v444_v54 = vand.u32 2147483648, %v425_v38  ;;  %vm448_vm6 = vcmp.eq.f32.partialorder %v426_v42, inf }
  0x80   : > { %v1064_v49 = vadd.f32 1e-08, %v422_v46  ;;  %v1066_v50 = vadd.f32 1e-08, %v423_v47  ;;  %vm450_vm7 = vcmp.eq.f32.partialorder %v426_v42, 0.0  ;;  %v451_v56 = vand.u32 2147483648, %v426_v42 }
  0x81   : > { %vm455_vm8 = vcmp.eq.f32.partialorder %v427_v0, inf  ;;  %vm457_vm9 = vcmp.eq.f32.partialorder %v427_v0, 0.0  ;;  %v458_v59 = vand.u32 2147483648, %v427_v0  ;;  %vm462_vm10 = vcmp.eq.f32.partialorder %v1060_v1, inf }
  0x82   : > { %732 = vrsqrt.f32 %v1064_v49  ;;  %vm464_vm11 = vcmp.eq.f32.partialorder %v1060_v1, 0.0  ;;  %v465_v62 = vand.u32 2147483648, %v1060_v1  ;;  %vm469_vm12 = vcmp.eq.f32.partialorder %v1062_v48, inf }
  0x83   : > { %v721_v51 = vpop.eup %720  ;;  %734 = vrsqrt.f32 %v1066_v50  ;;  %vm471_vm13 = vcmp.eq.f32.partialorder %v1062_v48, 0.0  ;;  %v472_v2 = vand.u32 2147483648, %v1062_v48  ;;  %vm476_vm14 = vcmp.eq.f32.partialorder %v1064_v49, inf }
  0x84   : > { %v433_v53 = vmul.f32 %v721_v51, %v424_v31  ;;  %vm478_vm15 = vcmp.eq.f32.partialorder %v1064_v49, 0.0  ;;  %v479_v10 = vand.u32 2147483648, %v1064_v49  ;;  %vm483_vm0 = vcmp.eq.f32.partialorder %v1066_v50, inf }
  0x85   : > { %v723_v57 = vpop.eup %722  ;;  %v486_v24 = vand.u32 2147483648, %v1066_v50 }
  0x86   : > { %v435_v55 = vsel %vm434_vm1, %v424_v31, %v433_v53  ;;  %v725_v60 = vpop.eup %724  ;;  %v440_v61 = vmul.f32 %v723_v57, %v425_v38  ;;  %vm485_vm1 = vcmp.eq.f32.partialorder %v1066_v50, 0.0 }
  0x87   : > { %v438_v58 = vsel %vm436_vm2, %v437_v52, %v435_v55  ;;  %v727_v9 = vpop.eup %726  ;;  %v447_v63 = vmul.f32 %v725_v60, %v426_v42 }
  0x88   : > { %v442_v3 = vsel %vm441_vm4, %v425_v38, %v440_v61  ;;  %v454_v4 = vmul.f32 %v727_v9, %v427_v0  ;;  %v490_v5 = vsel %vm489_vm3, %v438_v58, 0.0  ;;  %v729_v6 = vpop.eup %728 }
  0x89   : > { %v445_v7 = vsel %vm443_vm5, %v444_v54, %v442_v3  ;;  %v449_v8 = vsel %vm448_vm6, %v426_v42, %v447_v63  ;;  %v731_v11 = vpop.eup %730  ;;  %v461_v14 = vmul.f32 %v729_v6, %v1060_v1 }
  0x8a   : > { %v452_v12 = vsel %vm450_vm7, %v451_v56, %v449_v8  ;;  %v456_v13 = vsel %vm455_vm8, %v427_v0, %v454_v4  ;;  %v491_v15 = vsel %vm489_vm3, %v445_v7, 0.0  ;;  %v468_v18 = vmul.f32 %v731_v11, %v1062_v48 }
  0x8b   : > { %v459_v17 = vsel %vm457_vm9, %v458_v59, %v456_v13  ;;  %v492_v19 = vadd.f32 %v491_v15, %v490_v5  ;;  %v493_v20 = vsel %vm489_vm3, %v452_v12, 0.0  ;;  %v463_v22 = vsel %vm462_vm10, %v1060_v1, %v461_v14 }
  0x8c   : > { %v733_v16 = vpop.eup %732  ;;  %v495_v25 = vsel %vm489_vm3, %v459_v17, 0.0  ;;  %v466_v26 = vsel %vm464_vm11, %v465_v62, %v463_v22  ;;  %v470_v27 = vsel %vm469_vm12, %v1062_v48, %v468_v18 }
  0x8d   : > { %v735_v21 = vpop.eup %734  ;;  %v475_v23 = vmul.f32 %v733_v16, %v1064_v49  ;;  %v494_v29 = vadd.f32 %v493_v20, %v492_v19  ;;  %v473_v30 = vsel %vm471_vm13, %v472_v2, %v470_v27  ;;  %v497_v32 = vsel %vm489_vm3, %v466_v26, 0.0 }
  0x8e   : > { %v482_v28 = vmul.f32 %v735_v21, %v1066_v50  ;;  %v499_v36 = vsel %vm489_vm3, %v473_v30, 0.0 }
  0x8f   : > { %v477_v31 = vsel %vm476_vm14, %v1064_v49, %v475_v23  ;;  %v496_v35 = vadd.f32 %v495_v25, %v494_v29 }
  0x90   : > { %v480_v33 = vsel %vm478_vm15, %v479_v10, %v477_v31  ;;  %v484_v34 = vsel %vm483_vm0, %v1066_v50, %v482_v28 }
  0x91   : > { %v487_v37 = vsel %vm485_vm1, %v486_v24, %v484_v34  ;;  %v498_v38 = vadd.f32 %v497_v32, %v496_v35  ;;  %v501_v39 = vsel %vm489_vm3, %v480_v33, 0.0 }
  0x92   : > { %v503_v41 = vsel %vm489_vm3, %v487_v37, 0.0 }
  0x93   : > { %v500_v40 = vadd.f32 %v499_v36, %v498_v38 }
  0x95   : > { %v502_v42 = vadd.f32 %v501_v39, %v500_v40 }
  0x97   : > { %v504_v43 = vadd.f32 %v503_v41, %v502_v42 }
  0x99   : > { %505 = vadd.xlane.f32.xlu0 %v504_v43 }
 0x126   : > { %v506_v0 = vpop.xlane.xlu0 %505 }
 0x127   : > { %v507_v44 = vrot.slane %v506_v0, 4 }
 0x129   : > { %v508_v45 = vadd.f32 %v507_v44, %v506_v0 }
 0x12b   : > { %v509_v1 = vrot.slane %v508_v45, 2 }
 0x12d   : > { %v510_v46 = vadd.f32 %v509_v1, %v508_v45 }
 0x12f   : > { %v511_v47 = vrot.slane %v510_v46, 1 }
 0x131   : > { %v512_v48 = vadd.f32 %v511_v47, %v510_v46 }
 0x133   : > { %642 = vpush %v512_v48 }
 0x164   : > { %s643_s19 = spop %642 }
 0x165   : > { %s514_s20 = sadd.f32 %s643_s19, %s488_s23 }
 0x167   : > { %516 = sst [smem:[#allocation2]] %s514_s20 }
 0x168 PF: > { %p630_p8 = scmp.lt.s32.totalorder %s906_s13, 1 }
 0x169   : > { %s523_s21 = sld [smem:[#allocation2]] (!%p630_p8) }
 0x16a   : > { %522 = sbr.rel (%p630_p8) target bundleno = 371 (0x173), region = 40 }
 0x16f   : > { %s524_s24 = smul.f32 (!%p630_p8), 0.0009765625, %s523_s21 }
 0x171   : > { %v525_v49 = vstv %s524_s24 }
 0x172   : > { %526 = vst [vmem:[%s1011_s16] sm:$0xff] %v525_v49  ;;  %527 = vst [vmem:[%s1011_s16 + $0x8] sm:$0xff] %v525_v49 }
 0x173 PF: > { %s1125_s28 = scalar_lea.sflag [#allocation5], %s136_s14  ;;  %p1201_p4 = scmp.ne.s32.totalorder %s1195_s26, 0 }
 0x174   : > { %s632_s29 = sshll.u32 (%p1201_p4), %s906_s13, 3 }
 0x175   : > { %535 = sbr.rel (!%p1201_p4) target bundleno = 407 (0x197), region = 44  ;;  %s537_s30 = ssub.s32 (%p1201_p4), 10, %s632_s29 }
 0x176   : > { %p538_p11 = scmp.lt.s32.totalorder (%p1201_p4), %s537_s30, 8 }
 0x17c   : > { %s1212_s30 = smov (!%p538_p11, %s537_s30), 8 }
 0x17d   : > { %s1130_s2 = sshll.u32 %s1212_s30, 5 }
 0x17e   : > { %s542_s3 = ssub.s32 256, %s1130_s2 }
 0x17f   : > { %543 = vsyncadd %s1125_s28, %s542_s3  ;;  %p634_p13 = scmp.ne.s32.totalorder %s1130_s2, 0  ;;  %s641_s5 = sshll.u32 %s906_s13, 8 }
 0x180   : > { %s1139_s18 = scalar_lea.hbm %s1191_s1, %s641_s5  ;;  %s549_s14 = sshll.u32 %s1011_s16, 4  ;;  %s550_s14 = int_to_ptr.vmem [resolvable:$true] %s549_s14 }
 0x181   : > { %s766_s4 = scalar_lea.vmem %s550_s14, %s1130_s2  ;;  %s861_s9 = smov [#allocation6]  }
 0x182   : > { %p767_p10 = scmp.ne.s32.totalorder %s550_s14, %s766_s4  ;;  %s770_s23 = sshll.u32 %s861_s9, 4  ;;  %s771_s23 = int_to_ptr.vmem [resolvable:$false] %s770_s23 }
 0x183   : > { %s772_s19 = scalar_lea.vmem %s771_s23, 512  ;;  %p773_p2 = scmp.lt.s32.totalorder %s550_s14, %s771_s23 }
 0x184   : > { %p768_p12 = pnand %p767_p10, %p634_p13  ;;  %p774_p7 = scmp.lt.s32.totalorder %s772_s19, %s766_s4 }
 0x186   : > { %p769_p6 = pneg %p768_p12  ;;  %p775_p0 = por %p774_p7, %p773_p2 }
 0x188   : > { %p776_p5 = pnand %p775_p0, %p769_p6 }
 0x18a   : > { %779 = shalt.err (!%p776_p5)
}
 0x18b   : > { %s780_s13 = scalar_lea.hbm %s1139_s18, %s1130_s2  ;;  %s784_s21 = scalar_lea.hbm %s1191_s1, 320 }
 0x18c   : > { %p781_p9 = scmp.ne.s32.totalorder %s1139_s18, %s780_s13  ;;  %p785_p8 = scmp.lt.u32.totalorder %s1139_s18, %s1191_s1 }
 0x18d   : > { %p786_p4 = scmp.lt.u32.totalorder %s784_s21, %s780_s13  ;;  %p788_p10 = scmp.lt.u32.totalorder %s780_s13, %s1139_s18 }
 0x18e   : > { %p782_p1 = pnand %p781_p9, %p634_p13 }
 0x18f   : > { %p787_p11 = por %p786_p4, %p785_p8 }
 0x190   : > { %p783_p3 = pneg %p782_p1 }
 0x191   : > { %p789_p12 = por %p788_p10, %p787_p11 }
 0x193   : > { %p790_p6 = pnand %p789_p12, %p783_p3 }
 0x195   : > { %793 = shalt.err (!%p790_p6)
}
 0x196   : > { %552 = dma.vmem_to_hbm [thread:$0]  (%p634_p13), %s550_s14, %s1130_s2, %s1139_s18, %s1125_s28  }
 0x197 PF: > { %s561_s30 = sand.u32 1, %s832_s6   ;;  %p1202_p2 = scmp.ne.s32.totalorder %s1196_s27, 0 }
 0x198   : > { %p1203_p7 = scmp.ge.s32.totalorder %s856_s12, 2  ;;  %s562_s3 = scalar_lea.sflag [#allocation5], %s561_s30 }
 0x19a   : > { %p654_p0 = pnand %p1203_p7, %p1202_p2 }
 0x19c   : > { %827 = dma.done.wait (!%p654_p0), %s562_s3, 256  }
 0x19d   : > { %829 = vsyncadd (!%p654_p0), %s562_s3, 4294967040  ;;  %p14_p13 = scmp.ge.s32.totalorder %s910_s15, 4   ;;  %s1204_s6 = smov %s836_s7 }
 0x19e   : > { %s1205_s7 = smov %s840_s8  ;;  %s1206_s8 = smov %s941_s25 }
 0x19f   : > { %s1207_s9 = smov %s848_s10  ;;  %s1208_s10 = smov %s852_s11 }
 0x1a0   : > { %s1209_s11 = smov %s929_s22  ;;  %s1210_s12 = smov %s910_s15 }
 0x1a1   :  { %16 = sbr.rel (!%p14_p13) target bundleno = 7 (0x7), region = 83 }
 0x1a8   :  { %567 = vsyncpa [#allocation4], 1 }
 0x1a9   :  { %569 = vsyncpa [#allocation4 + $0x1], 1 }
 0x1aa   :  { %570 = vsyncpa [#allocation5], 1 }
 0x1ab   :  { %572 = vsyncpa [#allocation5 + $0x1], 1 }

</bundles_post_ra>
